<compile_context>
chip_gen: v5e
topology: v5e:2x2
jax: 0.10.0
libtpu: 0.0.40
codegen_flags: <defaults>
</compile_context>

<pallas_src>
import jax
import jax.numpy as jnp
from jax.experimental import pallas as pl
from jax.experimental.pallas import tpu as pltpu

_LANES = 128           # lane width of a vreg
_MAX_TILE_ROWS = 4096  # 4096 x 128 x 4B = 2 MiB per output tile (4 MiB double-buffered)


def _round_up(a, m):
    return -(-a // m) * m


def _constant_fill_kernel(s_ref, o_ref):
    # s_ref: (1,) precomputed sigmoid(constant) scalar in SMEM
    # o_ref: (tile_rows, 128) lane-dense output tile in VMEM
    o_ref[...] = jnp.full(o_ref.shape, s_ref[0], dtype=jnp.float32)


def constant_forward(x, constant):
    """Pallas equivalent of Constant.forward.

    x:        (B, C, H, W) array — only its shape is used.
    constant: (1,) float32 learnable scalar.
    returns:  (B, H, W) float32 = sigmoid(constant * ones(B, H, W))
    """
    B, _, H, W = x.shape
    total = B * H * W

    # Hoist the transcendental: one scalar sigmoid in the wrapper (f32).
    s = jax.nn.sigmoid(constant.astype(jnp.float32))

    # Lane-dense flattened output slab: exactly (rows, 128) — no row padding.
    rows = pl.cdiv(total, _LANES)
    if rows <= 8:
        # Tiny output: single block equal to the full array dims (valid block shape).
        tile_rows = rows
    else:
        # Split into >= 2 tiles (multiple of 8 rows) so both v7x TensorCores share the
        # writeback; cap the tile at 2 MiB to amortize per-step overhead without
        # stressing VMEM on any generation.
        tile_rows = min(_MAX_TILE_ROWS, _round_up(pl.cdiv(rows, 2), 8))
    grid = (pl.cdiv(rows, tile_rows),)   # ragged last block is masked by Pallas

    flat = pl.pallas_call(
        _constant_fill_kernel,
        out_shape=jax.ShapeDtypeStruct((rows, _LANES), jnp.float32),
        grid=grid,
        in_specs=[pl.BlockSpec(memory_space=pltpu.SMEM)],
        out_specs=pl.BlockSpec((tile_rows, _LANES), lambda i: (i, 0)),
        compiler_params=pltpu.CompilerParams(dimension_semantics=("parallel",)),
        cost_estimate=pl.CostEstimate(
            flops=0,
            transcendentals=0,
            bytes_accessed=rows * _LANES * 4,
        ),
    )(s)

    # Restore the (B, H, W) shape outside the kernel.  When total % 128 == 0 the
    # slice is a no-op and this is a pure metadata reshape.
    return flat.reshape(-1)[:total].reshape(B, H, W)


if __name__ == "__main__":
    key = jax.random.PRNGKey(0)
    k_param, k_x = jax.random.split(key)

    # Deterministic parameter init mirroring: 0.1 * torch.randn(1)
    constant = 0.1 * jax.random.normal(k_param, (1,), dtype=jnp.float32)

    # Small NCHW input consistent with the module's forward (only shape matters).
    x = jax.random.normal(k_x, (2, 4, 16, 16), dtype=jnp.float32)

    out = constant_forward(x, constant)
    out = jax.block_until_ready(out)

    # Reference check in plain JAX.
    ref = jax.nn.sigmoid(constant[0] * jnp.ones((2, 16, 16), dtype=jnp.float32))
    assert out.shape == (2, 16, 16)
    assert jnp.allclose(out, ref, atol=1e-6), "mismatch vs reference"

    print("KERNEL_OK")
</pallas_src>

<mosaic_0001>
module attributes {stable_mosaic.version = 11 : i64} {
  func.func @_constant_fill_kernel(%arg0: i32, %arg1: memref<1xf32, #tpu.memory_space<smem>>, %arg2: memref<4x128xf32, #tpu.memory_space<vmem>>) attributes {dimension_semantics = [#tpu.dimension_semantics<parallel>], iteration_bounds = array<i64: 1>, scalar_prefetch = 0 : i64, scratch_operands = 0 : i64, tpu.core_type = #tpu.core_type<tc>, window_params = [{transform_indices = @transform_0, window_bounds = array<i64: 1>}, {transform_indices = @transform_1, window_bounds = array<i64: 4, 128>}]} {
    %c0 = arith.constant 0 : index
    %0 = memref.load %arg1[%c0] : memref<1xf32, #tpu.memory_space<smem>>
    %1 = vector.broadcast %0 : f32 to vector<4x128xf32>
    %c0_0 = arith.constant 0 : index
    %c0_1 = arith.constant 0 : index
    %2 = vector.load %arg2[%c0_0, %c0_1] : memref<4x128xf32, #tpu.memory_space<vmem>>, vector<4x128xf32>
    tpu.vector_store %arg2[%c0_0, %c0_1], %1 {strides = array<i32>} : memref<4x128xf32, #tpu.memory_space<vmem>>, vector<4x128xf32>,
    return
  }
  func.func @transform_0(%arg0: i32) -> i32 {
    %c0_i32 = arith.constant 0 : i32
    %c0_i32_0 = arith.constant 0 : i32
    return %c0_i32 : i32
  }
  func.func @transform_1(%arg0: i32) -> (i32, i32) {
    %c0_i32 = arith.constant 0 : i32
    %c0_i32_0 = arith.constant 0 : i32
    return %arg0, %c0_i32 : i32, i32
  }
}

</mosaic_0001>

<bundles_post_ra>
// kernel: tpu_custom_call.1
= control target key start
LH: loop header
LB: loop body
LE: loop exit
PB: predicated region body
PF: predicated region fallthrough
CT: control target
= control target key end

     0   :  { %s73_s0 = inlined_call_operand.<no memory space> [shape: f32[1], index: 0, kind: input, shape index: {}]   ;;  %s74_s1 = inlined_call_operand.hbm [shape: f32[4,128], index: 1, kind: output, shape index: {}]  }
   0x1   :  { %v11_v0 = vstv %s73_s0 }
   0x2   :  { %7 = vsyncpa [#allocation4], 0  ;;  %s20_s10 = sshll.u32 %s74_s1, 4  ;;  %12 = vst [vmem:[#allocation3] sm:$0xf] %v11_v0  ;;  %s56_s11 = smov [#allocation3]   ;;  %s21_s10 = int_to_ptr.hbm [resolvable:$true] %s20_s10 }
   0x3   :  { %s18_s12 = sshll.u32 %s56_s11, 4  ;;  %s19_s12 = int_to_ptr.vmem [resolvable:$true] %s18_s12 }
   0x4   :  { %23 = dma.vmem_to_hbm [thread:$0]  %s19_s12, 64, %s21_s10, [#allocation4]  }
   0x5   :  { %54 = dma.done.wait [#allocation4], 64  }
   0x6   :  { %55 = vsyncadd [#allocation4], 4294967232 }
   0x7   :  { %28 = vsyncpa [#allocation4], 1 }

</bundles_post_ra>
